<compile_context>
chip_gen: v7x
topology: tpu7x:2x2x1
jax: 0.10.0
libtpu: 0.0.40
codegen_flags: <defaults>
</compile_context>

<pallas_src>
import functools

import jax
import jax.numpy as jnp
from jax.experimental import pallas as pl
from jax.experimental.pallas import tpu as pltpu

IGNORE_INDEX = -100  # nn.CrossEntropyLoss default ignore_index


def _round_up(a, b):
    return -(-a // b) * b


def _ce_kernel(logits_ref, labels_ref, lsum_ref, lcnt_ref,
               m_ref, s_ref, p_ref, *, vc, v_total, needs_lane_mask):
    """Online-softmax cross entropy over one (tm, vc) logits chunk.

    Grid = (B, T, Vk); the trailing V axis is a reduction carried in the
    (tm, 1) f32 scratch accumulators (running max / exp-sum / picked logit).
    """
    vk = pl.program_id(2)

    @pl.when(vk == 0)
    def _init():
        m_ref[...] = jnp.full(m_ref.shape, -jnp.inf, m_ref.dtype)
        s_ref[...] = jnp.zeros(s_ref.shape, s_ref.dtype)
        p_ref[...] = jnp.zeros(p_ref.shape, p_ref.dtype)

    x = logits_ref[0]                 # (tm, vc) in native dtype (bf16 / f32)
    labels = labels_ref[...]          # (tm, 1) int32; IGNORE_INDEX on pad rows

    # Local lane index within this V chunk (loop-invariant constant pattern).
    col = jax.lax.broadcasted_iota(jnp.int32, x.shape, 1)

    if needs_lane_mask:
        # Last chunk reads past V: neutralize out-of-range lanes.
        lane_ok = (col + vk * vc) < v_total
        x = jnp.where(lane_ok, x, jnp.array(-jnp.inf, x.dtype))

    # ---- online log-sum-exp: max in native dtype, exp/accumulate in f32 ----
    chunk_max = jnp.max(x, axis=-1, keepdims=True).astype(jnp.float32)
    m_prev = m_ref[...]
    m_new = jnp.maximum(m_prev, chunk_max)
    alpha = jnp.exp(m_prev - m_new)                        # (tm, 1)
    e = jnp.exp(x.astype(jnp.float32) - m_new)             # (tm, vc) f32
    s_ref[...] = alpha * s_ref[...] + jnp.sum(e, axis=-1, keepdims=True)
    m_ref[...] = m_new

    # ---- fused target-logit pick (compare/select stays in native dtype) ----
    local_lab = labels - vk * vc                            # (tm, 1) i32
    hit = col == local_lab
    picked = jnp.sum(jnp.where(hit, x, jnp.zeros_like(x)),
                     axis=-1, keepdims=True).astype(jnp.float32)
    p_ref[...] = p_ref[...] + picked

    @pl.when(vk == pl.num_programs(2) - 1)
    def _finalize():
        valid = labels != IGNORE_INDEX                      # (tm, 1) bool
        lse = jnp.log(s_ref[...]) + m_ref[...]
        # where-SELECT (not multiply) so NaN/Inf from padded / garbage rows
        # cannot leak into the sum.
        per_row = jnp.where(valid, lse - p_ref[...], 0.0)
        lsum_ref[...] = jnp.full(lsum_ref.shape, jnp.sum(per_row), jnp.float32)
        lcnt_ref[...] = jnp.full(lcnt_ref.shape,
                                 jnp.sum(valid.astype(jnp.float32)),
                                 jnp.float32)


def _pick_tiles(B, S, V, itemsize):
    """Generation-aware (tm, Vc, T) selection."""
    mult = 8 if itemsize >= 4 else 16
    S1 = S - 1

    # Vocab chunk: whole vocab if small; otherwise a 128-multiple divisor of V
    # (no ragged chunk) if one exists <= 2048; otherwise 2048 + lane mask.
    if V <= 2048:
        vc = V
    else:
        vc = 0
        for cand in range(2048, 127, -128):
            if V % cand == 0:
                vc = cand
                break
        if vc == 0:
            vc = 2048

    # VMEM capacity -> row-tile target (smaller on v7x's 64 MiB VMEM).
    try:
        vmem_cap = int(pltpu.get_tpu_info().vmem_capacity_bytes)
    except Exception:
        vmem_cap = 64 << 20            # conservative fallback
    small_vmem = vmem_cap <= (64 << 20)
    tm = 256 if small_vmem else 512

    seq_cap = _round_up(S1, mult)
    tm = max(mult, min(tm, seq_cap))

    # v7x megacore balance: prefer an even number of row tiles when B == 1.
    T = -(-S1 // tm)
    if B == 1 and T % 2 == 1 and S1 > mult:
        tm2 = _round_up(-(-S1 // (T + 1)), mult)
        if mult <= tm2 < tm:
            tm = tm2
            T = -(-S1 // tm)

    return tm, vc, T, small_vmem


@jax.jit
def gpt_lm_loss(logits, labels):
    """Equivalent of GPTLMLoss().forward(logits, labels).

    logits: [B, S, V] float (f32 or bf16 — streamed in its native dtype)
    labels: [B, S] int
    returns scalar float32 mean cross-entropy over shifted tokens.
    """
    B, S, V = logits.shape
    assert S >= 2, "need at least 2 sequence positions to shift"
    itemsize = jnp.dtype(logits.dtype).itemsize

    tm, vc, T, small_vmem = _pick_tiles(B, S, V, itemsize)
    S1 = S - 1
    Vk = -(-V // vc)
    needs_lane_mask = (V % vc) != 0

    # Tiny label preprocessing: shift, pad tail rows with IGNORE_INDEX so they
    # (and any partial-edge logits rows) contribute nothing, lay out as a
    # column so the (tm, 1) block satisfies TPU tiling rules.
    lab = labels[:, 1:].astype(jnp.int32)                    # (B, S-1)
    pad = T * tm - S1
    if pad:
        lab = jnp.pad(lab, ((0, 0), (0, pad)), constant_values=IGNORE_INDEX)
    lab_col = lab.reshape(B * T * tm, 1)                     # (B*T*tm, 1)

    # VMEM budget, including the in-kernel temporaries (f32 cast, exp, iota).
    chunk = tm * vc
    need = (2 * chunk * itemsize        # double-buffered native logits chunk
            + 3 * chunk * 4             # f32 cast + exp temp + int32 iota
            + 2 * tm * 128 * 4          # labels block (lane-padded), 2 bufs
            + 3 * tm * 128 * 4          # f32 scratch accumulators (lane-padded)
            + (4 << 20))                # headroom
    cap = (56 << 20) if small_vmem else (100 << 20)
    vmem_limit = int(min(max(need, 32 << 20), cap))

    kernel = functools.partial(_ce_kernel, vc=vc, v_total=V,
                               needs_lane_mask=needs_lane_mask)
    out_shape = jax.ShapeDtypeStruct((B, T, 1, 128), jnp.float32)

    lsum, lcnt = pl.pallas_call(
        kernel,
        out_shape=(out_shape, out_shape),
        grid_spec=pltpu.PrefetchScalarGridSpec(
            num_scalar_prefetch=0,
            grid=(B, T, Vk),
            in_specs=[
                # Original [B, S, V] logits, no copy: row tile t of batch b,
                # vocab chunk v (shift handled by label masking).
                pl.BlockSpec((1, tm, vc), lambda b, t, v: (b, t, v)),
                pl.BlockSpec((tm, 1), lambda b, t, v, _T=T: (b * _T + t, 0)),
            ],
            out_specs=[
                pl.BlockSpec((1, 1, 1, 128), lambda b, t, v: (b, t, 0, 0)),
                pl.BlockSpec((1, 1, 1, 128), lambda b, t, v: (b, t, 0, 0)),
            ],
            scratch_shapes=[pltpu.VMEM((tm, 1), jnp.float32)] * 3,
        ),
        compiler_params=pltpu.CompilerParams(
            # Each (b, t) owns its output block -> both leading axes can be
            # sharded across TensorCores; V is the carried reduction.
            dimension_semantics=("parallel", "parallel", "arbitrary"),
            vmem_limit_bytes=vmem_limit,
        ),
    )(logits, lab_col)

    loss_sum = jnp.sum(lsum[:, :, 0, 0])
    valid_cnt = jnp.sum(lcnt[:, :, 0, 0])
    # All-ignored input divides by zero (NaN), matching torch's default.
    return (loss_sum / valid_cnt).astype(jnp.float32)


def _reference_loss(logits, labels):
    """Pure-JAX reference of GPTLMLoss for a sanity check."""
    V = logits.shape[-1]
    sl = logits[:, :-1, :].reshape(-1, V).astype(jnp.float32)
    tl = labels[:, 1:].reshape(-1)
    lse = jax.nn.logsumexp(sl, axis=-1)
    picked = jnp.take_along_axis(sl, tl[:, None], axis=-1)[:, 0]
    valid = tl != IGNORE_INDEX
    per_row = jnp.where(valid, lse - picked, 0.0)
    return jnp.sum(per_row) / jnp.sum(valid.astype(jnp.float32))


if __name__ == "__main__":
    key = jax.random.PRNGKey(0)
    B, S, V = 2, 8, 32
    k1, k2 = jax.random.split(key)
    logits = jax.random.normal(k1, (B, S, V), dtype=jnp.float32)
    labels = jax.random.randint(k2, (B, S), 0, V, dtype=jnp.int32)

    loss = jax.block_until_ready(gpt_lm_loss(logits, labels))

    ref = _reference_loss(logits, labels)
    assert jnp.allclose(loss, ref, atol=1e-5, rtol=1e-5), (loss, ref)

    print("KERNEL_OK")
</pallas_src>

<mosaic_0001>
module attributes {stable_mosaic.version = 11 : i64} {
  func.func @_ce_kernel(%arg0: i32, %arg1: i32, %arg2: i32, %arg3: memref<1x8x32xf32, #tpu.memory_space<vmem>>, %arg4: memref<8x1xi32, #tpu.memory_space<vmem>>, %arg5: memref<1x1x1x128xf32, #tpu.memory_space<vmem>>, %arg6: memref<1x1x1x128xf32, #tpu.memory_space<vmem>>, %arg7: memref<8x1xf32, #tpu.memory_space<vmem>>, %arg8: memref<8x1xf32, #tpu.memory_space<vmem>>, %arg9: memref<8x1xf32, #tpu.memory_space<vmem>>) attributes {dimension_semantics = [#tpu.dimension_semantics<parallel>, #tpu.dimension_semantics<parallel>, #tpu.dimension_semantics<arbitrary>], iteration_bounds = array<i64: 2, 1, 1>, scalar_prefetch = 0 : i64, scratch_operands = 3 : i64, tpu.core_type = #tpu.core_type<tc>, window_params = [{transform_indices = @transform_0, window_bounds = array<i64: 1, 8, 32>}, {transform_indices = @transform_1, window_bounds = array<i64: 8, 1>}, {transform_indices = @transform_2, window_bounds = array<i64: 1, 1, 1, 128>}, {transform_indices = @transform_3, window_bounds = array<i64: 1, 1, 1, 128>}]} {
    %c0_i32 = arith.constant 0 : i32
    %0 = arith.cmpi eq, %arg2, %c0_i32 : i32
    %1 = arith.extui %0 : i1 to i32
    %c0_i32_0 = arith.constant 0 : i32
    %2 = arith.cmpi ne, %1, %c0_i32_0 : i32
    scf.if %2 {
      %cst_22 = arith.constant 0xFF800000 : f32
      %38 = vector.broadcast %cst_22 : f32 to vector<8x1xf32>
      %c0_23 = arith.constant 0 : index
      %c0_24 = arith.constant 0 : index
      %39 = vector.load %arg7[%c0_23, %c0_24] : memref<8x1xf32, #tpu.memory_space<vmem>>, vector<8x1xf32>
      tpu.vector_store %arg7[%c0_23, %c0_24], %38 {strides = array<i32>} : memref<8x1xf32, #tpu.memory_space<vmem>>, vector<8x1xf32>,
      %cst_25 = arith.constant 0.000000e+00 : f32
      %40 = vector.broadcast %cst_25 : f32 to vector<8x1xf32>
      %c0_26 = arith.constant 0 : index
      %c0_27 = arith.constant 0 : index
      %41 = vector.load %arg8[%c0_26, %c0_27] : memref<8x1xf32, #tpu.memory_space<vmem>>, vector<8x1xf32>
      tpu.vector_store %arg8[%c0_26, %c0_27], %40 {strides = array<i32>} : memref<8x1xf32, #tpu.memory_space<vmem>>, vector<8x1xf32>,
      %cst_28 = arith.constant 0.000000e+00 : f32
      %42 = vector.broadcast %cst_28 : f32 to vector<8x1xf32>
      %c0_29 = arith.constant 0 : index
      %c0_30 = arith.constant 0 : index
      %43 = vector.load %arg9[%c0_29, %c0_30] : memref<8x1xf32, #tpu.memory_space<vmem>>, vector<8x1xf32>
      tpu.vector_store %arg9[%c0_29, %c0_30], %42 {strides = array<i32>} : memref<8x1xf32, #tpu.memory_space<vmem>>, vector<8x1xf32>,
    } else {
    }
    %c0 = arith.constant 0 : index
    %c0_1 = arith.constant 0 : index
    %c0_2 = arith.constant 0 : index
    %3 = vector.load %arg3[%c0, %c0_1, %c0_2] : memref<1x8x32xf32, #tpu.memory_space<vmem>>, vector<1x8x32xf32>
    %4 = vector.shape_cast %3 : vector<1x8x32xf32> to vector<8x32xf32>
    %c0_3 = arith.constant 0 : index
    %c0_4 = arith.constant 0 : index
    %5 = vector.load %arg4[%c0_3, %c0_4] : memref<8x1xi32, #tpu.memory_space<vmem>>, vector<8x1xi32>
    %6 = tpu.iota {dimensions = array<i32: 1>} : vector<8x32xi32>
    %cst = arith.constant dense<0xFF800000> : vector<8xf32>
    %7 = vector.multi_reduction <maximumf>, %4, %cst [1] : vector<8x32xf32> to vector<8xf32>
    %8 = vector.shape_cast %7 : vector<8xf32> to vector<8x1xf32>
    %c0_5 = arith.constant 0 : index
    %c0_6 = arith.constant 0 : index
    %9 = vector.load %arg7[%c0_5, %c0_6] : memref<8x1xf32, #tpu.memory_space<vmem>>, vector<8x1xf32>
    %10 = arith.maximumf %9, %8 : vector<8x1xf32>
    %11 = arith.subf %9, %10 : vector<8x1xf32>
    %12 = math.exp %11 : vector<8x1xf32>
    %13 = vector.broadcast %10 : vector<8x1xf32> to vector<8x32xf32>
    %14 = arith.subf %4, %13 : vector<8x32xf32>
    %15 = math.exp %14 : vector<8x32xf32>
    %c0_7 = arith.constant 0 : index
    %c0_8 = arith.constant 0 : index
    %16 = vector.load %arg8[%c0_7, %c0_8] : memref<8x1xf32, #tpu.memory_space<vmem>>, vector<8x1xf32>
    %17 = arith.mulf %12, %16 : vector<8x1xf32>
    %cst_9 = arith.constant dense<0.000000e+00> : vector<8xf32>
    %18 = vector.multi_reduction <add>, %15, %cst_9 [1] : vector<8x32xf32> to vector<8xf32>
    %19 = vector.shape_cast %18 : vector<8xf32> to vector<8x1xf32>
    %20 = arith.addf %17, %19 : vector<8x1xf32>
    %c0_10 = arith.constant 0 : index
    %c0_11 = arith.constant 0 : index
    %21 = vector.load %arg8[%c0_10, %c0_11] : memref<8x1xf32, #tpu.memory_space<vmem>>, vector<8x1xf32>
    tpu.vector_store %arg8[%c0_10, %c0_11], %20 {strides = array<i32>} : memref<8x1xf32, #tpu.memory_space<vmem>>, vector<8x1xf32>,
    %c0_12 = arith.constant 0 : index
    %c0_13 = arith.constant 0 : index
    %22 = vector.load %arg7[%c0_12, %c0_13] : memref<8x1xf32, #tpu.memory_space<vmem>>, vector<8x1xf32>
    tpu.vector_store %arg7[%c0_12, %c0_13], %10 {strides = array<i32>} : memref<8x1xf32, #tpu.memory_space<vmem>>, vector<8x1xf32>,
    %c32_i32 = arith.constant 32 : i32
    %23 = arith.muli %arg2, %c32_i32 : i32
    %24 = vector.broadcast %23 : i32 to vector<8x1xi32>
    %25 = arith.subi %5, %24 : vector<8x1xi32>
    %26 = vector.broadcast %25 : vector<8x1xi32> to vector<8x32xi32>
    %27 = arith.cmpi eq, %6, %26 : vector<8x32xi32>
    %cst_14 = arith.constant 0.000000e+00 : f32
    %28 = vector.broadcast %cst_14 : f32 to vector<8x32xf32>
    %29 = arith.select %27, %4, %28 : vector<8x32xi1>, vector<8x32xf32>
    %cst_15 = arith.constant dense<0.000000e+00> : vector<8xf32>
    %30 = vector.multi_reduction <add>, %29, %cst_15 [1] : vector<8x32xf32> to vector<8xf32>
    %31 = vector.shape_cast %30 : vector<8xf32> to vector<8x1xf32>
    %c0_16 = arith.constant 0 : index
    %c0_17 = arith.constant 0 : index
    %32 = vector.load %arg9[%c0_16, %c0_17] : memref<8x1xf32, #tpu.memory_space<vmem>>, vector<8x1xf32>
    %33 = arith.addf %32, %31 : vector<8x1xf32>
    %c0_18 = arith.constant 0 : index
    %c0_19 = arith.constant 0 : index
    %34 = vector.load %arg9[%c0_18, %c0_19] : memref<8x1xf32, #tpu.memory_space<vmem>>, vector<8x1xf32>
    tpu.vector_store %arg9[%c0_18, %c0_19], %33 {strides = array<i32>} : memref<8x1xf32, #tpu.memory_space<vmem>>, vector<8x1xf32>,
    %c0_i32_20 = arith.constant 0 : i32
    %35 = arith.cmpi eq, %arg2, %c0_i32_20 : i32
    %36 = arith.extui %35 : i1 to i32
    %c0_i32_21 = arith.constant 0 : i32
    %37 = arith.cmpi ne, %36, %c0_i32_21 : i32
    scf.if %37 {
      %c-100_i32 = arith.constant -100 : i32
      %38 = vector.broadcast %c-100_i32 : i32 to vector<8x1xi32>
      %39 = arith.cmpi ne, %5, %38 : vector<8x1xi32>
      %c0_22 = arith.constant 0 : index
      %c0_23 = arith.constant 0 : index
      %40 = vector.load %arg8[%c0_22, %c0_23] : memref<8x1xf32, #tpu.memory_space<vmem>>, vector<8x1xf32>
      %41 = math.log %40 : vector<8x1xf32>
      %c0_24 = arith.constant 0 : index
      %c0_25 = arith.constant 0 : index
      %42 = vector.load %arg7[%c0_24, %c0_25] : memref<8x1xf32, #tpu.memory_space<vmem>>, vector<8x1xf32>
      %43 = arith.addf %41, %42 : vector<8x1xf32>
      %c0_26 = arith.constant 0 : index
      %c0_27 = arith.constant 0 : index
      %44 = vector.load %arg9[%c0_26, %c0_27] : memref<8x1xf32, #tpu.memory_space<vmem>>, vector<8x1xf32>
      %45 = arith.subf %43, %44 : vector<8x1xf32>
      %cst_28 = arith.constant 0.000000e+00 : f32
      %46 = vector.broadcast %cst_28 : f32 to vector<8x1xf32>
      %47 = arith.select %39, %45, %46 : vector<8x1xi1>, vector<8x1xf32>
      %48 = vector.shape_cast %47 : vector<8x1xf32> to vector<1x8x1xf32>
      %cst_29 = arith.constant dense<0.000000e+00> : vector<1xf32>
      %49 = vector.multi_reduction <add>, %48, %cst_29 [1, 2] : vector<1x8x1xf32> to vector<1xf32>
      %50 = vector.shape_cast %49 : vector<1xf32> to vector<1x1x1xf32>
      %51 = vector.extract %50[0, 0, 0] : f32 from vector<1x1x1xf32>
      %52 = vector.broadcast %51 : f32 to vector<1x1x1x128xf32>
      %c0_30 = arith.constant 0 : index
      %c0_31 = arith.constant 0 : index
      %c0_32 = arith.constant 0 : index
      %c0_33 = arith.constant 0 : index
      %53 = vector.load %arg5[%c0_30, %c0_31, %c0_32, %c0_33] : memref<1x1x1x128xf32, #tpu.memory_space<vmem>>, vector<1x1x1x128xf32>
      tpu.vector_store %arg5[%c0_30, %c0_31, %c0_32, %c0_33], %52 {strides = array<i32>} : memref<1x1x1x128xf32, #tpu.memory_space<vmem>>, vector<1x1x1x128xf32>,
      %54 = arith.extui %39 : vector<8x1xi1> to vector<8x1xi32>
      %55 = arith.sitofp %54 : vector<8x1xi32> to vector<8x1xf32>
      %56 = vector.shape_cast %55 : vector<8x1xf32> to vector<1x8x1xf32>
      %cst_34 = arith.constant dense<0.000000e+00> : vector<1xf32>
      %57 = vector.multi_reduction <add>, %56, %cst_34 [1, 2] : vector<1x8x1xf32> to vector<1xf32>
      %58 = vector.shape_cast %57 : vector<1xf32> to vector<1x1x1xf32>
      %59 = vector.extract %58[0, 0, 0] : f32 from vector<1x1x1xf32>
      %60 = vector.broadcast %59 : f32 to vector<1x1x1x128xf32>
      %c0_35 = arith.constant 0 : index
      %c0_36 = arith.constant 0 : index
      %c0_37 = arith.constant 0 : index
      %c0_38 = arith.constant 0 : index
      %61 = vector.load %arg6[%c0_35, %c0_36, %c0_37, %c0_38] : memref<1x1x1x128xf32, #tpu.memory_space<vmem>>, vector<1x1x1x128xf32>
      tpu.vector_store %arg6[%c0_35, %c0_36, %c0_37, %c0_38], %60 {strides = array<i32>} : memref<1x1x1x128xf32, #tpu.memory_space<vmem>>, vector<1x1x1x128xf32>,
    } else {
    }
    return
  }
  func.func @transform_0(%arg0: i32, %arg1: i32, %arg2: i32) -> (i32, i32, i32) {
    %c0_i32 = arith.constant 0 : i32
    return %arg0, %arg1, %arg2 : i32, i32, i32
  }
  func.func @transform_1(%arg0: i32, %arg1: i32, %arg2: i32) -> (i32, i32) {
    %c1_i32 = arith.constant 1 : i32
    %0 = arith.muli %arg0, %c1_i32 : i32
    %1 = arith.addi %0, %arg1 : i32
    %c0_i32 = arith.constant 0 : i32
    %c0_i32_0 = arith.constant 0 : i32
    return %1, %c0_i32 : i32, i32
  }
  func.func @transform_2(%arg0: i32, %arg1: i32, %arg2: i32) -> (i32, i32, i32, i32) {
    %c0_i32 = arith.constant 0 : i32
    %c0_i32_0 = arith.constant 0 : i32
    %c0_i32_1 = arith.constant 0 : i32
    return %arg0, %arg1, %c0_i32, %c0_i32_0 : i32, i32, i32, i32
  }
  func.func @transform_3(%arg0: i32, %arg1: i32, %arg2: i32) -> (i32, i32, i32, i32) {
    %c0_i32 = arith.constant 0 : i32
    %c0_i32_0 = arith.constant 0 : i32
    %c0_i32_1 = arith.constant 0 : i32
    return %arg0, %arg1, %c0_i32, %c0_i32_0 : i32, i32, i32, i32
  }
}

</mosaic_0001>

<bundles_post_ra>
// kernel: gpt_lm_loss.1
= control target key start
LH: loop header
LB: loop body
LE: loop exit
PB: predicated region body
PF: predicated region fallthrough
CT: control target
= control target key end

     0   :  { %s561_s12 = smov 0   ;;  %s563_s13 = smov 0   ;;  %s618_s0 = inlined_call_operand.vmem [shape: f32[2,8,32], index: 0, kind: input, shape index: {}]   ;;  %s619_s1 = inlined_call_operand.vmem [shape: s32[16,1], index: 1, kind: input, shape index: {}]   ;;  %s620_s2 = inlined_call_operand.vmem [shape: f32[2,1,1,128], index: 2, kind: output, shape index: {0}]   ;;  %s621_s3 = inlined_call_operand.vmem [shape: f32[2,1,1,128], index: 3, kind: output, shape index: {1}]  }
   0x1   :  { %s565_s14 = smov 0  }
   0x2 LB: > { %s33_s15 = sadd.s32 1, %s532_s13  ;;  %p469_p0 = scmp.ge.s32.totalorder %s536_s14, 1  ;;  %s536_s14 = sphi %s565_s14, %s14_s14   ;;  %s532_s13 = sphi %s563_s13, %s623_s13   ;;  %s528_s12 = sphi %s561_s12, %s622_s12  }
   0x3   : > { %p35_p1 = scmp.ge.s32.totalorder %s33_s15, 2  ;;  %p185_p2 = scmp.lt.s32.totalorder %s536_s14, 3 }
   0x5   : > { %s625_s15 = smov (%p35_p1, %s33_s15), 0  ;;  %p186_p3 = pnand %p469_p0, %p185_p2 }
   0x6   : > { %p226_p4 = scmp.lt.s32.totalorder (!%p186_p3), %s528_s12, 1  ;;  %vm258_vm0 = vcmask (!%p186_p3), 7168   ;;  %v538_v0 = vmov (!%p186_p3), -inf   ;;  %vm266_vm1 = vcmask (!%p186_p3), 261120   ;;  %v539_v3 = vmov (!%p186_p3), 0  }
   0x7   : > { %189 = sbr.rel (%p186_p3) target bundleno = 685 (0x2ad), region = 28  ;;  %259 = vst.msk [vmem:[#allocation2] sm:$0xff] (!%p186_p3), %vm258_vm0, %v538_v0  ;;  %506 = vset.pattern.permute.xlu0 (!%p186_p3), %v539_v3  ;;  %507 = vset.pattern.permute.xlu1 (!%p186_p3), %v539_v3  ;;  %v540_v5 = vmov (!%p186_p3), 0.0   ;;  %v264_v13 = vlaneseq (!%p186_p3) }
   0x8   : > { %260 = vst.msk [vmem:[#allocation3] sm:$0xff] (!%p186_p3), %vm258_vm0, %v540_v5  ;;  %261 = vst.msk [vmem:[#allocation4] sm:$0xff] (!%p186_p3), %vm258_vm0, %v540_v5 }
   0x9   : > { %v265_v14 = vand.u32 (!%p186_p3), 127, %v264_v13 }
   0xe   : > { %s627_s12 = smov (!%p226_p4, %s528_s12), 1  ;;  %v270_v6 = vld [vmem:[#allocation2] sm:$0xff] }
   0xf   : > { %s470_s16 = sshll.u32 %s627_s12, 3  ;;  %v283_v24 = vld [vmem:[#allocation3] sm:$0xff]  ;;  %v303_v28 = vld [vmem:[#allocation4] sm:$0xff]  ;;  %s247_s25 = scalar_lea.vmem %s620_s2, %s627_s12 }
  0x10   : > { %s235_s19 = scalar_lea.vmem %s618_s0, %s470_s16  ;;  %s240_s22 = scalar_lea.vmem %s619_s1, %s470_s16 }
  0x11   : > { %v262_v1 = vld [vmem:[%s235_s19] sm:$0xff]  ;;  %s253_s29 = scalar_lea.vmem %s621_s3, %s627_s12 }
  0x12   : > { %v267_v2 = vsel %vm266_vm1, %v262_v1, -inf  ;;  %v263_v4 = vld [vmem:[%s240_s22] sm:$0xff] }
  0x13   : > { %268 = vmax.xlane.f32.xlu0 %v267_v2  ;;  %296 = vperm.xlu1 %507, %v263_v4   ;;  %vm309_vm3 = vcmp.ne.s32.totalorder %v263_v4, 4294967196 }
  0x14   : > { %v472_v20 = vsel %vm309_vm3, 1.0, %v540_v5 }
  0x15   : > { %v332_v21 = vsel %vm258_vm0, %v472_v20, 0.0 }
  0x92   : > { %v297_v15 = vpop.permute.xlu1 %296 }
  0x93   : > { %vm298_vm2 = vcmp.eq.s32.totalorder %v265_v14, %v297_v15 }
  0x94   : > { %v299_v17 = vsel %vm298_vm2, %v262_v1, 0.0 }
  0x95   : > { %v300_v19 = vsel %vm266_vm1, %v299_v17, 0.0 }
  0xa0   : > { %v269_v7 = vpop.xlane.xlu0 %268 }
  0xa1   : > { %v271_v8 = vmax.f32 %v270_v6, %v269_v7 }
  0xa3   : > { %v272_v9 = vsub.f32 %v270_v6, %v271_v8  ;;  %291 = vst.msk [vmem:[#allocation2] sm:$0xff] %vm258_vm0, %v271_v8  ;;  %277 = vperm.xlu0 %506, %v271_v8  }
  0xa5   : > { %v273_v22 = vmul.f32 1.442695, %v272_v9 }
  0xaa   : > { %v313_v34 = vld [vmem:[#allocation2] sm:$0xff] }
  0xc2   : > { %333 = vadd.xlane.f32.xlu0 %v332_v21 }
 0x122   : > { %v278_v10 = vpop.permute.xlu0 %277 }
 0x123   : > { %v280_v11 = vsub.f32 %v262_v1, %v278_v10 }
 0x125   : > { %v281_v12 = vmul.f32 1.442695, %v280_v11 }
 0x127   : > { %508 = vpow2.f32 %v281_v12 }
 0x128   : > { %510 = vpow2.f32 %v273_v22 }
 0x131   : > { %v509_v16 = vpop.eup %508 }
 0x132   : > { %v285_v18 = vsel %vm266_vm1, %v509_v16, 0.0  ;;  %v511_v23 = vpop.eup %510 }
 0x133   : > { %286 = vadd.xlane.f32.xlu1 %v285_v18  ;;  %v284_v25 = vmul.f32 %v511_v23, %v283_v24 }
 0x137   : > { %301 = vadd.xlane.f32.xlu1 %v300_v19 }
 0x14f   : > { %v334_v40 = vpop.xlane.xlu0 %333 }
 0x150   : > { %v335_v41 = vrot.slane %v334_v40, 4 }
 0x152   : > { %v336_v42 = vadd.f32 %v335_v41, %v334_v40 }
 0x154   : > { %v337_v43 = vrot.slane %v336_v42, 2 }
 0x156   : > { %v338_v47 = vadd.f32 %v337_v43, %v336_v42 }
 0x158   : > { %v339_v50 = vrot.slane %v338_v47, 1 }
 0x15a   : > { %v340_v53 = vadd.f32 %v339_v50, %v338_v47 }
 0x1c0   : > { %v287_v26 = vpop.xlane.xlu1 %286 }
 0x1c1   : > { %v288_v27 = vadd.f32 %v287_v26, %v284_v25 }
 0x1c3   : > { %290 = vst.msk [vmem:[#allocation3] sm:$0xff] %vm258_vm0, %v288_v27 }
 0x1c4   : > { %v302_v29 = vpop.xlane.xlu1 %301 }
 0x1c5   : > { %v304_v30 = vadd.f32 %v303_v28, %v302_v29 }
 0x1c7   : > { %305 = vst.msk [vmem:[#allocation4] sm:$0xff] %vm258_vm0, %v304_v30 }
 0x1ca   : > { %v310_v31 = vld [vmem:[#allocation3] sm:$0xff] }
 0x1cb   : > { %512 = vlog2.f32 %v310_v31 }
 0x1ce   : > { %v315_v35 = vld [vmem:[#allocation4] sm:$0xff] }
 0x1d5   : > { %v513_v32 = vpop.eup %512 }
 0x1d6   : > { %v312_v33 = vmul.f32 0.6931472, %v513_v32 }
 0x1d8   : > { %v314_v36 = vadd.f32 %v313_v34, %v312_v33 }
 0x1da   : > { %v316_v37 = vsub.f32 %v314_v36, %v315_v35 }
 0x1dc   : > { %v317_v38 = vsel %vm309_vm3, %v316_v37, 0.0 }
 0x1dd   : > { %v318_v39 = vsel %vm258_vm0, %v317_v38, 0.0 }
 0x1de   : > { %319 = vadd.xlane.f32.xlu1 %v318_v39 }
 0x26b   : > { %v320_v44 = vpop.xlane.xlu1 %319 }
 0x26c   : > { %v321_v45 = vrot.slane %v320_v44, 4 }
 0x26e   : > { %v322_v46 = vadd.f32 %v321_v45, %v320_v44 }
 0x270   : > { %v323_v48 = vrot.slane %v322_v46, 2 }
 0x272   : > { %v324_v49 = vadd.f32 %v323_v48, %v322_v46 }
 0x274   : > { %v325_v51 = vrot.slane %v324_v49, 1 }
 0x276   : > { %v326_v52 = vadd.f32 %v325_v51, %v324_v49 }
 0x278   : > { %475 = vpush %v326_v52 }
 0x279   : > { %477 = vpush %v340_v53 }
 0x2a9   : > { %s476_s26 = spop %475 }
 0x2aa   : > { %v328_v54 = vstv %s476_s26  ;;  %s478_s30 = spop %477 }
 0x2ab   : > { %329 = vst [vmem:[%s247_s25] sm:$0x1] %v328_v54  ;;  %v342_v55 = vstv %s478_s30 }
 0x2ac   : > { %343 = vst [vmem:[%s253_s29] sm:$0x1] %v342_v55 }
 0x2ad PF: > { %s14_s14 = sadd.s32 1, %s536_s14   ;;  %s622_s12 = smov %s532_s13 }
 0x2ae   : > { %p11_p5 = scmp.ge.s32.totalorder %s14_s14, 4   ;;  %s623_s13 = smov %s625_s15 }
 0x2b0   :  { %13 = sbr.rel (!%p11_p5) target bundleno = 2 (0x2), region = 81 }

</bundles_post_ra>
